<compile_context>
chip_gen: v6e
topology: v6e:2x2x1
jax: 0.10.0
libtpu: 0.0.40
codegen_flags: <defaults>
</compile_context>

<pallas_src>
import jax
import jax.numpy as jnp
from jax.experimental import pallas as pl
from jax.experimental.pallas import tpu as pltpu


def _round_up(a, m):
    return (a + m - 1) // m * m


def _pick_td(Dp, cap):
    """Largest multiple-of-128 divisor of Dp (<= cap), preferring >= 2 D tiles (v7x)."""
    cap = max(128, cap)
    cands = [t for t in range(128, Dp + 1, 128) if Dp % t == 0 and t <= cap]
    if not cands:
        return 128
    multi = [t for t in cands if Dp // t >= 2]
    return max(multi) if multi else max(cands)


def _make_size_pool_kernel(n_nodes, tn, ragged_n):
    """n_nodes/tn/ragged_n are static Python values captured at trace time."""

    def kernel(batch_ref, isd_ref, x_ref, out_ref, sums_acc):
        # batch_ref: [1, tn]   int32 graph ids (OOB lanes hold garbage -> masked)
        # isd_ref:   [Gp, 1]   f32 inv_sqrt(deg) per graph (precomputed in wrapper)
        # x_ref:     [tn, td]  f32 node-feature tile (OOB rows garbage -> masked)
        # out_ref:   [Gp, td]  f32 pooled graph embeddings (written at finalize)
        # sums_acc:  [Gp, td]  f32 VMEM accumulator, persists across the N grid axis
        k = pl.program_id(1)

        @pl.when(k == 0)
        def _init():
            sums_acc[...] = jnp.zeros_like(sums_acc)

        Gp = sums_acc.shape[0]
        bt = batch_ref[...]                                          # [1, tn]
        gid = jax.lax.broadcasted_iota(jnp.int32, (Gp, tn), 0)       # [Gp, tn]
        match = bt == gid                                            # exact membership

        x = x_ref[...]
        if ragged_n:
            # Mask rows past the true node count: OOB VMEM contents are undefined and
            # 0 * NaN would otherwise poison the accumulator.
            lane_idx = k * tn + jax.lax.broadcasted_iota(jnp.int32, (1, tn), 1)
            match = jnp.logical_and(match, lane_idx < n_nodes)       # [Gp, tn]
            row_idx = k * tn + jax.lax.broadcasted_iota(jnp.int32, (tn, 1), 0)
            x = jnp.where(row_idx < n_nodes, x, 0.0)                 # [tn, td]

        assign = match.astype(jnp.float32)                           # exact 0/1 one-hot

        # Segment-sum on the MXU: [Gp, tn] @ [tn, td] -> [Gp, td], f32 accumulate.
        sums_acc[...] += jnp.dot(
            assign, x,
            preferred_element_type=jnp.float32,
            precision=jax.lax.Precision.HIGHEST,
        )

        @pl.when(k == pl.num_programs(1) - 1)
        def _finalize():
            out_ref[...] = (sums_acc[...] * isd_ref[...]).astype(out_ref.dtype)

    return kernel


def size_pool(x, batch, num_graphs, *, tn=1024, td=None):
    """x: [N, D] float32, batch: [N] int32 in [0, num_graphs). Returns [num_graphs, D]."""
    N, D = x.shape
    G = int(num_graphs)

    # Lane/sublane-friendly sizes (no padded copies of x are materialized).
    Gp = _round_up(max(G, 1), 8)                       # graphs on sublanes
    Dp = _round_up(D, 128)                             # output features on lanes
    td = _pick_td(Dp, 1024 if td is None else int(td)) # divides Dp exactly
    tn = _round_up(max(128, min(int(tn), _round_up(N, 128))), 128)

    grid = (Dp // td, pl.cdiv(N, tn))                  # (D parallel, N reduction last)
    ragged_n = (N % tn) != 0

    # Cheap wrapper-side prep (O(N) ints / O(G) floats, no N*D copies).
    x_in = x.astype(jnp.float32)
    batch_2d = batch.astype(jnp.int32).reshape(1, N)
    deg = jax.ops.segment_sum(jnp.ones((N,), jnp.float32), batch_2d[0], Gp)
    inv_sqrt_deg = jnp.where(deg > 0, deg ** -0.5, 0.0).reshape(Gp, 1).astype(jnp.float32)

    # Explicit VMEM budget: double-buffered x/batch/out tiles + accumulator + headroom.
    est = 4 * (2 * tn * td + 2 * tn + 2 * Gp + 3 * Gp * td) + (16 << 20)
    vmem_limit = int(min(max(est, 32 << 20), 48 << 20))   # stays under v7x's 64 MiB

    kernel = _make_size_pool_kernel(N, tn, ragged_n)

    out_pad = pl.pallas_call(
        kernel,
        out_shape=jax.ShapeDtypeStruct((Gp, Dp), jnp.float32),
        grid_spec=pltpu.PrefetchScalarGridSpec(
            num_scalar_prefetch=0,
            grid=grid,
            in_specs=[
                pl.BlockSpec((1, tn), lambda j, k: (0, k)),    # batch ids
                pl.BlockSpec((Gp, 1), lambda j, k: (0, 0)),    # inv_sqrt(deg)
                pl.BlockSpec((tn, td), lambda j, k: (k, j)),   # node features (streamed)
            ],
            out_specs=pl.BlockSpec((Gp, td), lambda j, k: (0, j)),
            scratch_shapes=[
                pltpu.VMEM((Gp, td), jnp.float32),             # per-graph sums accumulator
            ],
        ),
        compiler_params=pltpu.CompilerParams(
            dimension_semantics=("parallel", "arbitrary"),
            vmem_limit_bytes=vmem_limit,
        ),
    )(batch_2d, inv_sqrt_deg, x_in)

    return out_pad[:G, :D]


def size_pool_ref(x, batch, num_graphs):
    """Pure-JAX reference: GraphSizeNorm followed by global_add_pool."""
    deg = jax.ops.segment_sum(jnp.ones((x.shape[0],), x.dtype), batch, num_graphs)
    inv_sqrt_deg = jnp.where(deg > 0, deg ** -0.5, 0.0)
    x_norm = x * inv_sqrt_deg[batch][:, None]
    return jax.ops.segment_sum(x_norm, batch, num_graphs)


if __name__ == "__main__":
    key = jax.random.PRNGKey(0)

    # --- small test (matches the module's typical small hidden dim) ---
    N, D, G = 16, 32, 2
    k0, k1 = jax.random.split(key)
    x = jax.random.normal(k0, (N, D), dtype=jnp.float32)
    batch = jnp.array([0] * 6 + [1] * 10, dtype=jnp.int32)   # graph 0: 6 nodes, graph 1: 10

    out = jax.block_until_ready(size_pool(x, batch, G))
    ref = size_pool_ref(x, batch, G)
    assert out.shape == (G, D)
    assert jnp.allclose(out, ref, atol=1e-5, rtol=1e-5)

    # --- ragged multi-D-tile test: default tiles, in-kernel row masking, D padding slice ---
    N2, D2, G2 = 300, 200, 5
    k2, k3 = jax.random.split(k1)
    x2 = jax.random.normal(k2, (N2, D2), dtype=jnp.float32)
    batch2 = jnp.sort(jax.random.randint(k3, (N2,), 0, G2, dtype=jnp.int32))

    out2 = jax.block_until_ready(size_pool(x2, batch2, G2))
    ref2 = size_pool_ref(x2, batch2, G2)
    assert out2.shape == (G2, D2)
    assert jnp.allclose(out2, ref2, atol=1e-4, rtol=1e-4)

    # --- forced multi-N-tile test: exercises the N-reduction accumulator + ragged last tile ---
    out3 = jax.block_until_ready(size_pool(x2, batch2, G2, tn=128, td=128))
    assert out3.shape == (G2, D2)
    assert jnp.allclose(out3, ref2, atol=1e-4, rtol=1e-4)

    print("KERNEL_OK")
</pallas_src>

<mosaic_0001>
module attributes {stable_mosaic.version = 11 : i64} {
  func.func @kernel(%arg0: i32, %arg1: i32, %arg2: memref<1x128xi32, #tpu.memory_space<vmem>>, %arg3: memref<8x1xf32, #tpu.memory_space<vmem>>, %arg4: memref<128x128xf32, #tpu.memory_space<vmem>>, %arg5: memref<8x128xf32, #tpu.memory_space<vmem>>, %arg6: memref<8x128xf32, #tpu.memory_space<vmem>>) attributes {dimension_semantics = [#tpu.dimension_semantics<parallel>, #tpu.dimension_semantics<arbitrary>], iteration_bounds = array<i64: 1, 1>, scalar_prefetch = 0 : i64, scratch_operands = 1 : i64, tpu.core_type = #tpu.core_type<tc>, window_params = [{transform_indices = @transform_0, window_bounds = array<i64: 1, 128>}, {pipeline_mode = #tpu.pipeline_mode<synchronous>, transform_indices = @transform_1, window_bounds = array<i64: 8, 1>}, {transform_indices = @transform_2, window_bounds = array<i64: 128, 128>}, {transform_indices = @transform_3, window_bounds = array<i64: 8, 128>}]} {
    %c0_i32 = arith.constant 0 : i32
    %0 = arith.cmpi eq, %arg1, %c0_i32 : i32
    %1 = arith.extui %0 : i1 to i32
    %c0_i32_0 = arith.constant 0 : i32
    %2 = arith.cmpi ne, %1, %c0_i32_0 : i32
    scf.if %2 {
      %cst_13 = arith.constant 0.000000e+00 : f32
      %35 = vector.broadcast %cst_13 : f32 to vector<8x128xf32>
      %c0_14 = arith.constant 0 : index
      %c0_15 = arith.constant 0 : index
      %36 = vector.load %arg6[%c0_14, %c0_15] : memref<8x128xf32, #tpu.memory_space<vmem>>, vector<8x128xf32>
      tpu.vector_store %arg6[%c0_14, %c0_15], %35 {strides = array<i32>} : memref<8x128xf32, #tpu.memory_space<vmem>>, vector<8x128xf32>,
    } else {
    }
    %c0 = arith.constant 0 : index
    %c0_1 = arith.constant 0 : index
    %3 = vector.load %arg2[%c0, %c0_1] : memref<1x128xi32, #tpu.memory_space<vmem>>, vector<1x128xi32>
    %4 = tpu.iota {dimensions = array<i32: 0>} : vector<8x128xi32>
    %5 = vector.broadcast %3 : vector<1x128xi32> to vector<8x128xi32>
    %6 = arith.cmpi eq, %5, %4 : vector<8x128xi32>
    %c0_2 = arith.constant 0 : index
    %c0_3 = arith.constant 0 : index
    %7 = vector.load %arg4[%c0_2, %c0_3] : memref<128x128xf32, #tpu.memory_space<vmem>>, vector<128x128xf32>
    %c128_i32 = arith.constant 128 : i32
    %8 = arith.muli %arg1, %c128_i32 : i32
    %9 = tpu.iota {dimensions = array<i32: 1>} : vector<1x128xi32>
    %10 = vector.broadcast %8 : i32 to vector<1x128xi32>
    %11 = arith.addi %10, %9 : vector<1x128xi32>
    %c16_i32 = arith.constant 16 : i32
    %12 = vector.broadcast %c16_i32 : i32 to vector<1x128xi32>
    %13 = arith.cmpi slt, %11, %12 : vector<1x128xi32>
    %14 = vector.broadcast %13 : vector<1x128xi1> to vector<8x128xi1>
    %15 = arith.andi %6, %14 : vector<8x128xi1>
    %c128_i32_4 = arith.constant 128 : i32
    %16 = arith.muli %arg1, %c128_i32_4 : i32
    %17 = tpu.iota {dimensions = array<i32: 0>} : vector<128x1xi32>
    %18 = vector.broadcast %16 : i32 to vector<128x1xi32>
    %19 = arith.addi %18, %17 : vector<128x1xi32>
    %c16_i32_5 = arith.constant 16 : i32
    %20 = vector.broadcast %c16_i32_5 : i32 to vector<128x1xi32>
    %21 = arith.cmpi slt, %19, %20 : vector<128x1xi32>
    %cst = arith.constant 0.000000e+00 : f32
    %22 = vector.shape_cast %21 : vector<128x1xi1> to vector<128x1xi1>
    %23 = vector.broadcast %22 : vector<128x1xi1> to vector<128x128xi1>
    %24 = vector.broadcast %cst : f32 to vector<128x128xf32>
    %25 = arith.select %23, %7, %24 : vector<128x128xi1>, vector<128x128xf32>
    %26 = arith.extui %15 : vector<8x128xi1> to vector<8x128xi32>
    %27 = arith.sitofp %26 : vector<8x128xi32> to vector<8x128xf32>
    %c0_6 = arith.constant 0 : index
    %c0_7 = arith.constant 0 : index
    %28 = vector.load %arg6[%c0_6, %c0_7] : memref<8x128xf32, #tpu.memory_space<vmem>>, vector<8x128xf32>
    %cst_8 = arith.constant dense<0.000000e+00> : vector<8x128xf32>
    %29 = tpu.matmul %27, %25, %cst_8 {dimension_numbers = #tpu.dot_dimension_numbers<[1], [0], [0], [1], [0, 0, 1, 1], [], []>, precision = #tpu.contract_precision<fp32>} : vector<8x128xf32>, vector<128x128xf32>, vector<8x128xf32> -> vector<8x128xf32>
    %30 = arith.addf %28, %29 : vector<8x128xf32>
    %c0_9 = arith.constant 0 : index
    %c0_10 = arith.constant 0 : index
    %31 = vector.load %arg6[%c0_9, %c0_10] : memref<8x128xf32, #tpu.memory_space<vmem>>, vector<8x128xf32>
    tpu.vector_store %arg6[%c0_9, %c0_10], %30 {strides = array<i32>} : memref<8x128xf32, #tpu.memory_space<vmem>>, vector<8x128xf32>,
    %c0_i32_11 = arith.constant 0 : i32
    %32 = arith.cmpi eq, %arg1, %c0_i32_11 : i32
    %33 = arith.extui %32 : i1 to i32
    %c0_i32_12 = arith.constant 0 : i32
    %34 = arith.cmpi ne, %33, %c0_i32_12 : i32
    scf.if %34 {
      %c0_13 = arith.constant 0 : index
      %c0_14 = arith.constant 0 : index
      %35 = vector.load %arg6[%c0_13, %c0_14] : memref<8x128xf32, #tpu.memory_space<vmem>>, vector<8x128xf32>
      %c0_15 = arith.constant 0 : index
      %c0_16 = arith.constant 0 : index
      %36 = vector.load %arg3[%c0_15, %c0_16] : memref<8x1xf32, #tpu.memory_space<vmem>>, vector<8x1xf32>
      %37 = vector.broadcast %36 : vector<8x1xf32> to vector<8x128xf32>
      %38 = arith.mulf %35, %37 : vector<8x128xf32>
      %c0_17 = arith.constant 0 : index
      %c0_18 = arith.constant 0 : index
      %39 = vector.load %arg5[%c0_17, %c0_18] : memref<8x128xf32, #tpu.memory_space<vmem>>, vector<8x128xf32>
      tpu.vector_store %arg5[%c0_17, %c0_18], %38 {strides = array<i32>} : memref<8x128xf32, #tpu.memory_space<vmem>>, vector<8x128xf32>,
    } else {
    }
    return
  }
  func.func @transform_0(%arg0: i32, %arg1: i32) -> (i32, i32) {
    %c0_i32 = arith.constant 0 : i32
    %c0_i32_0 = arith.constant 0 : i32
    return %c0_i32, %arg1 : i32, i32
  }
  func.func @transform_1(%arg0: i32, %arg1: i32) -> (i32, i32) {
    %c0_i32 = arith.constant 0 : i32
    %c0_i32_0 = arith.constant 0 : i32
    %c0_i32_1 = arith.constant 0 : i32
    return %c0_i32, %c0_i32_0 : i32, i32
  }
  func.func @transform_2(%arg0: i32, %arg1: i32) -> (i32, i32) {
    %c0_i32 = arith.constant 0 : i32
    return %arg1, %arg0 : i32, i32
  }
  func.func @transform_3(%arg0: i32, %arg1: i32) -> (i32, i32) {
    %c0_i32 = arith.constant 0 : i32
    %c0_i32_0 = arith.constant 0 : i32
    return %c0_i32, %arg0 : i32, i32
  }
}

</mosaic_0001>

<bundles_post_ra>
// kernel: tpu_custom_call.1
= control target key start
LH: loop header
LB: loop body
LE: loop exit
PB: predicated region body
PF: predicated region fallthrough
CT: control target
= control target key end

     0   :  { %8 = vsyncpa [#allocation4], 0  ;;  %s1030_s0 = inlined_call_operand.vmem [shape: s32[1,16], index: 0, kind: input, shape index: {}]   ;;  %s1031_s1 = inlined_call_operand.vmem [shape: f32[8,1], index: 1, kind: input, shape index: {}]   ;;  %s1032_s2 = inlined_call_operand.hbm [shape: f32[16,32], index: 2, kind: input, shape index: {}]   ;;  %s1033_s3 = inlined_call_operand.hbm [shape: f32[8,128], index: 3, kind: output, shape index: {}]  }
   0x1   :  { %9 = vsyncpa [#allocation5], 0 }
   0x2   :  { %18 = vsyncadd [#allocation4], 1792  ;;  %s953_s12 = smov [#allocation3]  }
   0x3   :  { %s19_s13 = sshll.u32 %s953_s12, 4  ;;  %s20_s13 = int_to_ptr.vmem [resolvable:$true] %s19_s13 }
   0x4   :  { %s917_s14 = scalar_lea.vmem %s20_s13, 256  ;;  %s921_s15 = scalar_lea.vmem %s20_s13, 2048 }
   0x5   :  { %p918_p0 = scmp.ne.s32.totalorder %s20_s13, %s917_s14  ;;  %p922_p1 = scmp.lt.s32.totalorder %s20_s13, %s20_s13 }
   0x6   :  { %p923_p2 = scmp.lt.s32.totalorder %s921_s15, %s917_s14 }
   0x8   :  { %p924_p3 = por %p923_p2, %p922_p1 }
   0xa   :  { %p925_p4 = pnand %p924_p3, %p918_p0 }
   0xc   :  { %928 = shalt.err (!%p925_p4)
}
   0xd   :  { %s954_s16 = smov 128   ;;  %s955_s17 = smov 8  }
   0xe   :  { %25 = dma.hbm_to_vmem [thread:$0]  %s1032_s2, 256, %s20_s13, [#allocation4], %s954_s16, %s954_s16, %s955_s17  }
   0xf   :  { %949 = dma.done.wait [#allocation4], 2048  }
  0x10   :  { %950 = vsyncadd [#allocation4], 4294965248  ;;  %v35_v0 = vlaneseq  ;;  %v956_v1 = vmov 0.0   ;;  %vm957_vm0 = vmmov 0   ;;  %v958_v3 = vmov 0   ;;  %v43_v5 = vld [vmem:[#allocation3 + $0x8] sm:$0xff] }
  0x11   :  { %858 = vmatprep.subr.mxu0 %v956_v1  ;;  %865 = vmatprep.subr.mxu1 %v956_v1  ;;  %v42_v6 = vld [vmem:[#allocation3] sm:$0xff]  ;;  %v208_v8 = vand.u32 4294901760, %v43_v5  ;;  %v959_v25 = vmov 1.0  }
  0x12   :  { %862 = vmatprep.mubr.msk.f32.mxu0 %vm957_vm0, %v956_v1  ;;  %v60_v2 = vand.u32 127, %v35_v0  ;;  %869 = vmatprep.mubr.msk.f32.mxu1 %vm957_vm0, %v956_v1  ;;  %v36_v4 = vshrl.u32 %v35_v0, 7  ;;  %v835_v7 = vld [vmem:[%s1030_s0] ss:$0 sm:$0xff]  ;;  %v211_v9 = vand.u32 4294901760, %v42_v6  ;;  %s960_s0 = smov [#allocation6]  }
  0x13   :  { %908 = vset.pattern.permute.xlu0 %v958_v3  ;;  %v812_v10 = vld [vmem:[%s1031_s1] sm:$0xff]  ;;  %859 = vmatpush3.msra.mxu0 %v208_v8  ;;  %v356_v12 = vsub.f32 %v43_v5, %v208_v8  ;;  %s826_s1 = sshll.u32 %s960_s0, 4  ;;  %s827_s1 = int_to_ptr.vmem [resolvable:$true] %s826_s1 }
  0x14   :  { %vm63_vm1 = vcmp.lt.s32.totalorder %v60_v2, 16  ;;  %vm41_vm2 = vcmp.eq.s32.totalorder %v835_v7, %v36_v4  ;;  %815 = vperm.xlu0 %908, %v812_v10   ;;  %v363_v14 = vsub.f32 %v42_v6, %v211_v9  ;;  %860 = vmatprep.subr.mxu0 %v956_v1  ;;  %s929_s23 = scalar_lea.vmem %s827_s1, 128  ;;  %p934_p6 = scmp.lt.s32.totalorder %s827_s1, %s827_s1 }
  0x15   :  { %vm996_vm3 = vmand %vm41_vm2, %vm63_vm1  ;;  %861 = vmatpush3.msra.mxu0 %v211_v9  ;;  %v357_v16 = vand.u32 4294901760, %v356_v12  ;;  %p930_p5 = scmp.ne.s32.totalorder %s827_s1, %s929_s23  ;;  %p935_p7 = scmp.lt.s32.totalorder %s929_s23, %s929_s23 }
  0x16   :  { %v836_v13 = vsel %vm996_vm3, 1.0, %v956_v1  ;;  %v364_v17 = vand.u32 4294901760, %v363_v14  ;;  %872 = vmatprep.subr.mxu0 %v956_v1 }
  0x17   :  { %v247_v15 = vsub.f32 %v836_v13, %v836_v13  ;;  %v358_v19 = vsub.f32 %v356_v12, %v357_v16  ;;  %p936_p8 = por %p935_p7, %p934_p6 }
  0x18   :  { %v365_v20 = vsub.f32 %v363_v14, %v364_v17 }
  0x19   :  { %v248_v18 = vand.u32 4294901760, %v247_v15  ;;  %v359_v22 = vand.u32 4294901760, %v358_v19  ;;  %p937_p9 = pnand %p936_p8, %p930_p5 }
  0x1a   :  { %v366_v23 = vand.u32 4294901760, %v365_v20 }
  0x1b   :  { %v249_v21 = vsub.f32 %v247_v15, %v248_v18  ;;  %866 = vmatpush3.msra.mxu1 %v359_v22 }
  0x1c   :  { %867 = vmatprep.subr.mxu1 %v956_v1 }
  0x1d   :  { %v250_v24 = vand.u32 4294901760, %v249_v21  ;;  %868 = vmatpush3.msra.mxu1 %v366_v23 }
  0x1e   :  { %870 = vmatmul.mubr.msk.f32.vlgmr.msra.gmra.mxu1 %vm996_vm3, %v959_v25  ;;  %879 = vmatprep.subr.mxu1 %v956_v1 }
  0x1f   :  { %863 = vmatmul.mubr.f32.vlgmr.msra.gmra.mxu0 %v250_v24  ;;  %880 = vmatpush3.msra.mxu1 %v208_v8 }
  0x20   :  { %873 = vmatpush3.msra.mxu0 %v356_v12  ;;  %876 = vmatprep.mubr.msk.f32.mxu0 %vm957_vm0, %v956_v1 }
  0x21   :  { %874 = vmatprep.subr.mxu0 %v956_v1  ;;  %881 = vmatprep.subr.mxu1 %v956_v1 }
  0x22   :  { %875 = vmatpush3.msra.mxu0 %v363_v14  ;;  %882 = vmatpush3.msra.mxu1 %v211_v9 }
  0x23   :  { %877 = vmatmul.mubr.f32.vlgmr.msra.gmra.mxu0 %v247_v15  ;;  %886 = vmatprep.subr.mxu0 %v956_v1 }
  0x24   :  { %883 = vmatprep.mubr.msk.f32.mxu1 %vm957_vm0, %v956_v1  ;;  %887 = vmatpush3.msra.mxu0 %v357_v16 }
  0x25   :  { %884 = vmatmul.mubr.f32.vlgmr.msra.gmra.mxu1 %v248_v18  ;;  %888 = vmatprep.subr.mxu0 %v956_v1 }
  0x26   :  { %893 = vmatprep.subr.mxu1 %v956_v1  ;;  %889 = vmatpush3.msra.mxu0 %v364_v17 }
  0x27   :  { %890 = vmatprep.mubr.msk.f32.mxu0 %vm957_vm0, %v956_v1  ;;  %894 = vmatpush3.msra.mxu1 %v208_v8 }
  0x28   :  { %891 = vmatmul.mubr.msk.f32.vlgmr.msra.gmra.mxu0 %vm996_vm3, %v959_v25  ;;  %895 = vmatprep.subr.mxu1 %v956_v1 }
  0x29   :  { %896 = vmatpush3.msra.mxu1 %v211_v9  ;;  %897 = vmatprep.mubr.msk.f32.mxu1 %vm957_vm0, %v956_v1 }
  0x2a   :  { %898 = vmatmul.mubr.msk.f32.vlgmr.msra.gmra.mxu1 %vm996_vm3, %v959_v25 }
  0x8f   :  { %v816_v39 = vpop.permute.xlu0 %815 }
  0xde   :  { %v403_v28 = vpop.f32.mrf.mxu1 }
  0xdf   :  { %v252_v26 = vpop.f32.mrf.mxu0 }
  0xe0   :  { %v404_v29 = vadd.f32 %v403_v28, %v252_v26  ;;  %v871_v30 = vpop.f32.mrf.mxu1 }
  0xe1   :  { %v864_v27 = vpop.f32.mrf.mxu0 }
  0xe3   :  { %v507_v31 = vpop.f32.mrf.mxu0 }
  0xe4   :  { %v508_v32 = vadd.f32 %v507_v31, %v404_v29 }
  0xe5   :  { %v878_v33 = vpop.f32.mrf.mxu0  ;;  %v596_v34 = vpop.f32.mrf.mxu1 }
  0xe6   :  { %v597_v35 = vadd.f32 %v596_v34, %v508_v32 }
  0xe7   :  { %v885_v36 = vpop.f32.mrf.mxu1 }
  0xe8   :  { %v715_v37 = vpop.f32.mrf.mxu0 }
  0xe9   :  { %v716_v38 = vadd.f32 %v715_v37, %v597_v35 }
  0xea   :  { %v892_v40 = vpop.f32.mrf.mxu0  ;;  %v802_v41 = vpop.f32.mrf.mxu1 }
  0xeb   :  { %v803_v42 = vadd.f32 %v802_v41, %v716_v38 }
  0xec   :  { %v899_v43 = vpop.f32.mrf.mxu1 }
  0xed   :  { %v818_v44 = vmul.f32 %v816_v39, %v803_v42 }
  0xef   :  { %819 = vst [vmem:[#allocation6] sm:$0xff] %v818_v44 }
  0xf0   :  { %940 = shalt.err (!%p937_p9)
}
  0xf1   :  { %829 = dma.vmem_to_hbm [thread:$0]  %s827_s1, 128, %s1033_s3, [#allocation5]  }
  0xf2   :  { %951 = dma.done.wait [#allocation5], 128  }
  0xf3   :  { %952 = vsyncadd [#allocation5], 4294967168 }
  0xf4   :  { %833 = vsyncpa [#allocation4], 1 }
  0xf5   :  { %834 = vsyncpa [#allocation5], 1 }

</bundles_post_ra>
